<compile_context>
chip_gen: v7x
topology: tpu7x:2x2x1
jax: 0.10.0
libtpu: 0.0.40
codegen_flags: <defaults>
</compile_context>

<pallas_src>
import functools

import jax
import jax.numpy as jnp
from jax import lax
from jax.experimental import pallas as pl
from jax.experimental.pallas import tpu as pltpu


def _round_up(x, m):
    return ((x + m - 1) // m) * m


def _direct_norm_loss_kernel(s_ref, t_ref, lab_ref, e_ref, o_ref, *,
                             batch, tile_rows, num_class_padded):
    i = pl.program_id(0)

    s = s_ref[...]                                  # (TB, D), input dtype
    t = t_ref[...]                                  # (TB, D)
    lab = lab_ref[...]                              # (TB, 1) int32

    # Per-class direction scores on the MXU:  M[r, c] = dot(s_r, e_c)  (centers are
    # already unit-norm).  Contraction over D, lane-dense (TB, NC_pad) f32 result.
    m = jnp.dot(s, e_ref[...], preferred_element_type=jnp.float32)     # (TB, NC_pad)

    # Gather the labelled class score: VPU select + XLU lane reduce (no (TB, D) temp).
    col = lax.broadcasted_iota(jnp.int32, (tile_rows, num_class_padded), 1)
    sc = jnp.sum(jnp.where(col == lab, m, 0.0), axis=-1, keepdims=True)  # (TB, 1)

    # Row squared-norms in f32 (upcast is a no-op for f32 inputs).
    s32 = s.astype(jnp.float32)
    t32 = t.astype(jnp.float32)
    ss = jnp.sum(s32 * s32, axis=-1, keepdims=True)                      # (TB, 1)
    tt = jnp.sum(t32 * t32, axis=-1, keepdims=True)                      # (TB, 1)

    # loss_i = 1 - dot(s, e_c) / max(||s||, ||t||) = 1 - sc * rsqrt(max(ss, tt)).
    per = 1.0 - sc * lax.rsqrt(jnp.maximum(ss, tt))                      # (TB, 1)

    # Mask batch-padding rows (their 0 * inf = NaN is replaced, not multiplied).
    rows = i * tile_rows + lax.broadcasted_iota(jnp.int32, (tile_rows, 1), 0)
    per = jnp.where(rows < batch, per, 0.0)

    # Per-tile partial sum written as a lane-dense (1, 8, 128) block.
    o_ref[...] = jnp.broadcast_to(jnp.sum(per), (1, 8, 128)).astype(jnp.float32)


@functools.partial(jax.jit, static_argnames=("tile_rows", "vmem_budget_bytes"))
def direct_norm_loss(s_emb, t_emb, center_table, labels, *,
                     tile_rows=None, vmem_budget_bytes=None):
    """s_emb, t_emb: (B, D) float32/bf16; center_table: (num_class, D); labels: (B,) int."""
    assert s_emb.shape == t_emb.shape
    B, D = s_emb.shape
    NC = center_table.shape[0]
    NC_pad = _round_up(NC, 128)          # lane-aligned class axis
    itemsize = jnp.dtype(s_emb.dtype).itemsize

    # ---- Per-generation VMEM budget (v5e/v6e: 128 MiB, v7x: 64 MiB per core). ----
    if vmem_budget_bytes is None:
        try:
            vmem_cap = int(pltpu.get_tpu_info().vmem_capacity_bytes)
        except Exception:
            vmem_cap = 64 * 1024 * 1024          # conservative: v7x per-core size
        vmem_limit = min((3 * vmem_cap) // 4, 96 * 1024 * 1024)
    else:
        vmem_limit = int(vmem_budget_bytes)
    budget = (vmem_limit * 7) // 8               # headroom for compiler-internal scratch

    # ---- Tile size from a full VMEM accounting (s/t tiles + labels + table + temps). ----
    table_bytes = NC_pad * D * itemsize
    single_buffer_table = table_bytes > (2 << 20)    # constant block: 1 buffer when large
    fixed_bytes = table_bytes * (1 if single_buffer_table else 2) + 2 * 8 * 128 * 4
    per_row_bytes = (2 * 2 * D * itemsize            # s, t tiles, double-buffered
                     + 2 * 128 * 4                   # (tb, 1) labels pad to lane 128, x2 bufs
                     + (NC_pad + 3 * D) * 4)         # f32 intermediates: M, s32/t32 upcasts
    avail = budget - fixed_bytes
    if tile_rows is not None:
        tb = max(8, _round_up(int(tile_rows), 8))
    else:
        tb = avail // per_row_bytes if avail > 0 else 8
        tb = max(8, min(1024, (tb // 8) * 8))

    rows = _round_up(B, 8)
    tb = min(tb, rows)
    if tile_rows is None and rows >= 16:
        # Guarantee >= 2 grid steps so the "parallel" axis feeds both v7x TensorCores.
        tb = min(tb, _round_up(-(-rows // 2), 8))
    num_tiles = -(-rows // tb)
    if tile_rows is None:
        # Balance tiles so the last tile is not mostly zero-padding (wasted HBM traffic).
        tb = _round_up(-(-rows // num_tiles), 8)
    B_pad = num_tiles * tb

    # ---- Host-side prep: pad batch, pre-normalize + transpose the class table. ----
    s_p = jnp.pad(s_emb, ((0, B_pad - B), (0, 0)))
    t_p = jnp.pad(t_emb, ((0, B_pad - B), (0, 0)))
    lab_p = jnp.pad(labels.astype(jnp.int32), (0, B_pad - B)).reshape(B_pad, 1)

    e_tab = center_table.astype(jnp.float32)
    e_tab = e_tab / jnp.linalg.norm(e_tab, axis=-1, keepdims=True)       # unit-norm rows
    e_tab = jnp.pad(e_tab, ((0, NC_pad - NC), (0, 0)))                   # pad AFTER normalize
    # Cast to the embedding dtype: with bf16 inputs the gather matmul hits the native
    # bf16 MXU datapath (table rounding is well inside the loss' tolerance).
    e_tab_t = e_tab.astype(s_emb.dtype).T                                # (D, NC_pad)

    if single_buffer_table:
        table_spec = pl.BlockSpec((D, NC_pad), lambda i: (0, 0),
                                  pipeline_mode=pl.Buffered(1))
    else:
        table_spec = pl.BlockSpec((D, NC_pad), lambda i: (0, 0))

    kernel = functools.partial(
        _direct_norm_loss_kernel,
        batch=B, tile_rows=tb, num_class_padded=NC_pad)

    partials = pl.pallas_call(
        kernel,
        out_shape=jax.ShapeDtypeStruct((num_tiles, 8, 128), jnp.float32),
        grid=(num_tiles,),
        in_specs=[
            pl.BlockSpec((tb, D), lambda i: (i, 0)),        # student tile
            pl.BlockSpec((tb, D), lambda i: (i, 0)),        # teacher tile
            pl.BlockSpec((tb, 1), lambda i: (i, 0)),        # labels tile
            table_spec,                                     # unit-norm class table (D, NC_pad)
        ],
        out_specs=pl.BlockSpec((1, 8, 128), lambda i: (i, 0, 0)),
        compiler_params=pltpu.CompilerParams(
            dimension_semantics=("parallel",),              # independent tiles -> v7x dual-TC
            vmem_limit_bytes=int(vmem_limit),
        ),
    )(s_p, t_p, lab_p, e_tab_t)

    # Final reduction + divide-by-B (forward's `nd_loss / len(labels)`).
    return jnp.sum(partials[:, 0, 0]) / jnp.float32(B)


def _reference(s_emb, t_emb, center_table, labels):
    centers = jnp.take(center_table, labels, axis=0)
    e_c = centers / jnp.linalg.norm(centers, axis=-1, keepdims=True)
    dot = jnp.sum(s_emb * e_c, axis=-1)
    max_norm = jnp.maximum(jnp.linalg.norm(s_emb, axis=-1),
                           jnp.linalg.norm(t_emb, axis=-1))
    return jnp.sum(1.0 - dot / max_norm) / s_emb.shape[0]


if __name__ == "__main__":
    key = jax.random.PRNGKey(0)
    k_s, k_t, k_c, k_l = jax.random.split(key, 4)

    B, D, NUM_CLASS = 8, 32, 10   # small, deterministic synthetic shapes

    s_emb = jax.random.normal(k_s, (B, D), dtype=jnp.float32)
    t_emb = jax.random.normal(k_t, (B, D), dtype=jnp.float32)
    # Deterministic synthetic T_EMB: one center vector per class (dense table instead of
    # the original str-keyed python dict).
    center_table = jax.random.normal(k_c, (NUM_CLASS, D), dtype=jnp.float32)
    labels = jax.random.randint(k_l, (B,), 0, NUM_CLASS, dtype=jnp.int32)

    loss = direct_norm_loss(s_emb, t_emb, center_table, labels)
    loss = jax.block_until_ready(loss)

    ref = _reference(s_emb, t_emb, center_table, labels)
    assert jnp.allclose(loss, ref, rtol=1e-4, atol=1e-4), (loss, ref)

    print("KERNEL_OK")
</pallas_src>

<mosaic_0001>
module attributes {stable_mosaic.version = 11 : i64} {
  func.func @_direct_norm_loss_kernel(%arg0: i32, %arg1: memref<8x32xf32, #tpu.memory_space<vmem>>, %arg2: memref<8x32xf32, #tpu.memory_space<vmem>>, %arg3: memref<8x1xi32, #tpu.memory_space<vmem>>, %arg4: memref<32x128xf32, #tpu.memory_space<vmem>>, %arg5: memref<1x8x128xf32, #tpu.memory_space<vmem>>) attributes {dimension_semantics = [#tpu.dimension_semantics<parallel>], iteration_bounds = array<i64: 1>, scalar_prefetch = 0 : i64, scratch_operands = 0 : i64, tpu.core_type = #tpu.core_type<tc>, window_params = [{transform_indices = @transform_0, window_bounds = array<i64: 8, 32>}, {transform_indices = @transform_1, window_bounds = array<i64: 8, 32>}, {transform_indices = @transform_2, window_bounds = array<i64: 8, 1>}, {pipeline_mode = #tpu.pipeline_mode<synchronous>, transform_indices = @transform_3, window_bounds = array<i64: 32, 128>}, {transform_indices = @transform_4, window_bounds = array<i64: 1, 8, 128>}]} {
    %c0 = arith.constant 0 : index
    %c0_0 = arith.constant 0 : index
    %0 = vector.load %arg1[%c0, %c0_0] : memref<8x32xf32, #tpu.memory_space<vmem>>, vector<8x32xf32>
    %c0_1 = arith.constant 0 : index
    %c0_2 = arith.constant 0 : index
    %1 = vector.load %arg2[%c0_1, %c0_2] : memref<8x32xf32, #tpu.memory_space<vmem>>, vector<8x32xf32>
    %c0_3 = arith.constant 0 : index
    %c0_4 = arith.constant 0 : index
    %2 = vector.load %arg3[%c0_3, %c0_4] : memref<8x1xi32, #tpu.memory_space<vmem>>, vector<8x1xi32>
    %c0_5 = arith.constant 0 : index
    %c0_6 = arith.constant 0 : index
    %3 = vector.load %arg4[%c0_5, %c0_6] : memref<32x128xf32, #tpu.memory_space<vmem>>, vector<32x128xf32>
    %cst = arith.constant dense<0.000000e+00> : vector<8x128xf32>
    %4 = tpu.matmul %0, %3, %cst {dimension_numbers = #tpu.dot_dimension_numbers<[1], [0], [0], [1], [0, 0, 1, 1], [], []>} : vector<8x32xf32>, vector<32x128xf32>, vector<8x128xf32> -> vector<8x128xf32>
    %5 = tpu.iota {dimensions = array<i32: 1>} : vector<8x128xi32>
    %6 = vector.broadcast %2 : vector<8x1xi32> to vector<8x128xi32>
    %7 = arith.cmpi eq, %5, %6 : vector<8x128xi32>
    %cst_7 = arith.constant 0.000000e+00 : f32
    %8 = vector.broadcast %cst_7 : f32 to vector<8x128xf32>
    %9 = arith.select %7, %4, %8 : vector<8x128xi1>, vector<8x128xf32>
    %cst_8 = arith.constant dense<0.000000e+00> : vector<8xf32>
    %10 = vector.multi_reduction <add>, %9, %cst_8 [1] : vector<8x128xf32> to vector<8xf32>
    %11 = vector.shape_cast %10 : vector<8xf32> to vector<8x1xf32>
    %12 = arith.mulf %0, %0 : vector<8x32xf32>
    %cst_9 = arith.constant dense<0.000000e+00> : vector<8xf32>
    %13 = vector.multi_reduction <add>, %12, %cst_9 [1] : vector<8x32xf32> to vector<8xf32>
    %14 = vector.shape_cast %13 : vector<8xf32> to vector<8x1xf32>
    %15 = arith.mulf %1, %1 : vector<8x32xf32>
    %cst_10 = arith.constant dense<0.000000e+00> : vector<8xf32>
    %16 = vector.multi_reduction <add>, %15, %cst_10 [1] : vector<8x32xf32> to vector<8xf32>
    %17 = vector.shape_cast %16 : vector<8xf32> to vector<8x1xf32>
    %18 = arith.maximumf %14, %17 : vector<8x1xf32>
    %19 = math.rsqrt %18 : vector<8x1xf32>
    %20 = arith.mulf %11, %19 : vector<8x1xf32>
    %cst_11 = arith.constant 1.000000e+00 : f32
    %21 = vector.broadcast %cst_11 : f32 to vector<8x1xf32>
    %22 = arith.subf %21, %20 : vector<8x1xf32>
    %c8_i32 = arith.constant 8 : i32
    %23 = arith.muli %arg0, %c8_i32 : i32
    %24 = tpu.iota {dimensions = array<i32: 0>} : vector<8x1xi32>
    %25 = vector.broadcast %23 : i32 to vector<8x1xi32>
    %26 = arith.addi %25, %24 : vector<8x1xi32>
    %c8_i32_12 = arith.constant 8 : i32
    %27 = vector.broadcast %c8_i32_12 : i32 to vector<8x1xi32>
    %28 = arith.cmpi slt, %26, %27 : vector<8x1xi32>
    %cst_13 = arith.constant 0.000000e+00 : f32
    %29 = vector.broadcast %cst_13 : f32 to vector<8x1xf32>
    %30 = arith.select %28, %22, %29 : vector<8x1xi1>, vector<8x1xf32>
    %31 = vector.shape_cast %30 : vector<8x1xf32> to vector<1x8x1xf32>
    %cst_14 = arith.constant dense<0.000000e+00> : vector<1xf32>
    %32 = vector.multi_reduction <add>, %31, %cst_14 [1, 2] : vector<1x8x1xf32> to vector<1xf32>
    %33 = vector.shape_cast %32 : vector<1xf32> to vector<1x1x1xf32>
    %34 = vector.extract %33[0, 0, 0] : f32 from vector<1x1x1xf32>
    %35 = vector.broadcast %34 : f32 to vector<1x8x128xf32>
    %c0_15 = arith.constant 0 : index
    %c0_16 = arith.constant 0 : index
    %c0_17 = arith.constant 0 : index
    %36 = vector.load %arg5[%c0_15, %c0_16, %c0_17] : memref<1x8x128xf32, #tpu.memory_space<vmem>>, vector<1x8x128xf32>
    tpu.vector_store %arg5[%c0_15, %c0_16, %c0_17], %35 {strides = array<i32>} : memref<1x8x128xf32, #tpu.memory_space<vmem>>, vector<1x8x128xf32>,
    return
  }
  func.func @transform_0(%arg0: i32) -> (i32, i32) {
    %c0_i32 = arith.constant 0 : i32
    %c0_i32_0 = arith.constant 0 : i32
    return %arg0, %c0_i32 : i32, i32
  }
  func.func @transform_1(%arg0: i32) -> (i32, i32) {
    %c0_i32 = arith.constant 0 : i32
    %c0_i32_0 = arith.constant 0 : i32
    return %arg0, %c0_i32 : i32, i32
  }
  func.func @transform_2(%arg0: i32) -> (i32, i32) {
    %c0_i32 = arith.constant 0 : i32
    %c0_i32_0 = arith.constant 0 : i32
    return %arg0, %c0_i32 : i32, i32
  }
  func.func @transform_3(%arg0: i32) -> (i32, i32) {
    %c0_i32 = arith.constant 0 : i32
    %c0_i32_0 = arith.constant 0 : i32
    %c0_i32_1 = arith.constant 0 : i32
    return %c0_i32, %c0_i32_0 : i32, i32
  }
  func.func @transform_4(%arg0: i32) -> (i32, i32, i32) {
    %c0_i32 = arith.constant 0 : i32
    %c0_i32_0 = arith.constant 0 : i32
    %c0_i32_1 = arith.constant 0 : i32
    return %arg0, %c0_i32, %c0_i32_0 : i32, i32, i32
  }
}

</mosaic_0001>

<bundles_post_ra>
// kernel: direct_norm_loss.1
= control target key start
LH: loop header
LB: loop body
LE: loop exit
PB: predicated region body
PF: predicated region fallthrough
CT: control target
= control target key end

     0   :  { %v175_v0 = vmov 0.0|0.0   ;;  %vm176_vm0 = vmmov 0   ;;  %v177_v4 = vmov 0.0   ;;  %v178_v7 = vmov 0   ;;  %s228_s3 = inlined_call_operand.vmem [shape: f32[32,128], index: 3, kind: input, shape index: {}]   ;;  %s229_s2 = inlined_call_operand.vmem [shape: s32[8,1], index: 2, kind: input, shape index: {}]   ;;  %s230_s1 = inlined_call_operand.vmem [shape: f32[8,32], index: 1, kind: input, shape index: {}]   ;;  %s231_s0 = inlined_call_operand.vmem [shape: f32[8,32], index: 0, kind: input, shape index: {}]   ;;  %s232_s4 = inlined_call_operand.vmem [shape: f32[1,8,128], index: 4, kind: output, shape index: {}]  }
   0x1   :  { %160 = vmatprep.subr.bf16.mxu0 %v175_v0  ;;  %v20_v1 = vld [vmem:[%s228_s3] sm:$0xff]  ;;  %v21_v2 = vld [vmem:[%s228_s3 + $0x8] sm:$0xff]  ;;  %v22_v3 = vld [vmem:[%s228_s3 + $0x10] sm:$0xff]  ;;  %157 = vmatprep.mubr.msk.f32.mxu0 %vm176_vm0, %v177_v4  ;;  %vm24_vm1 = vcmask 261120   ;;  %v98_v16 = vlaneseq  ;;  %vm126_vm3 = vcmask 7168  }
   0x2   :  { %v161_v5 = vpack.c.bf16 %v21_v2, %v20_v1  ;;  %v23_v6 = vld [vmem:[%s228_s3 + $0x18] sm:$0xff]  ;;  %172 = vset.pattern.permute.xlu0 %v178_v7  ;;  %v19_v8 = vld [vmem:[%s229_s2] sm:$0xff] }
   0x3   :  { %101 = vperm.xlu0 %172, %v19_v8   ;;  %v18_v9 = vld [vmem:[%s230_s1] sm:$0xff]  ;;  %v164_v10 = vpack.c.bf16 %v23_v6, %v22_v3  ;;  %v99_v17 = vand.u32 127, %v98_v16 }
   0x4   :  { %162 = vmatpush3.bf16.msra.mxu0 %v161_v5  ;;  %v111_v11 = vmul.f32 %v18_v9, %v18_v9  ;;  %v17_v13 = vld [vmem:[%s231_s0] sm:$0xff] }
   0x5   :  { %163 = vmatprep.subr.bf16.mxu0 %v175_v0  ;;  %v107_v14 = vmul.f32 %v17_v13, %v17_v13 }
   0x6   :  { %v112_v12 = vsel %vm24_vm1, %v111_v11, 0.0 }
   0x7   :  { %113 = vadd.xlane.f32.xlu1 %v112_v12  ;;  %v108_v15 = vsel %vm24_vm1, %v107_v14, 0.0 }
   0x8   :  { %165 = vmatpush3.bf16.msra.mxu0 %v164_v10 }
   0xb   :  { %158 = vmatmul.mubr.msk.f32.vlgmr.msra.gmra.mrb[0].mxu0 %vm24_vm1, %v17_v13 }
  0x22   :  { %109 = vadd.xlane.f32.xlu0 %v108_v15 }
  0x82   :  { %v102_v18 = vpop.permute.xlu0 %101 }
  0x83   :  { %vm103_vm2 = vcmp.eq.s32.totalorder %v99_v17, %v102_v18 }
  0x94   :  { %v114_v22 = vpop.xlane.xlu1 %113 }
  0xaf   :  { %v110_v23 = vpop.xlane.xlu0 %109 }
  0xb0   :  { %v115_v24 = vmax.f32 %v110_v23, %v114_v22 }
  0xb2   :  { %173 = vrsqrt.f32 %v115_v24 }
  0xbc   :  { %v174_v25 = vpop.eup %173 }
  0xde   :  { %v94_v19 = vpop.f32.mrb[0].mxu0 }
  0xdf   :  { %v159_v20 = vpop.f32.mrb[1].mxu0  ;;  %v104_v21 = vsel %vm103_vm2, %v94_v19, 0.0 }
  0xe0   :  { %105 = vadd.xlane.f32.xlu1 %v104_v21 }
 0x16d   :  { %v106_v26 = vpop.xlane.xlu1 %105 }
 0x16e   :  { %v117_v27 = vmul.f32 %v174_v25, %v106_v26 }
 0x170   :  { %v118_v28 = vsub.f32 1.0, %v117_v27 }
 0x172   :  { %v127_v29 = vsel %vm126_vm3, %v118_v28, 0.0 }
 0x173   :  { %128 = vadd.xlane.f32.xlu1 %v127_v29 }
 0x200   :  { %v129_v30 = vpop.xlane.xlu1 %128 }
 0x201   :  { %v130_v31 = vrot.slane %v129_v30, 4 }
 0x203   :  { %v131_v32 = vadd.f32 %v130_v31, %v129_v30 }
 0x205   :  { %v132_v33 = vrot.slane %v131_v32, 2 }
 0x207   :  { %v133_v34 = vadd.f32 %v132_v33, %v131_v32 }
 0x209   :  { %v134_v35 = vrot.slane %v133_v34, 1 }
 0x20b   :  { %v135_v36 = vadd.f32 %v134_v35, %v133_v34 }
 0x20d   :  { %166 = vpush %v135_v36 }
 0x23e   :  { %s167_s0 = spop %166 }
 0x23f   :  { %v137_v37 = vstv %s167_s0 }
 0x240   :  { %138 = vst [vmem:[%s232_s4] sm:$0xff] %v137_v37 }

</bundles_post_ra>
